<compile_context>
chip_gen: v7x
topology: tpu7x:2x2x1
jax: 0.10.0
libtpu: 0.0.40
codegen_flags: <defaults>
</compile_context>

<pallas_src>
import jax
import jax.numpy as jnp
import numpy as np
from jax import lax
from jax.experimental import pallas as pl
from jax.experimental.pallas import tpu as pltpu


def _round_up(x: int, m: int) -> int:
    return ((x + m - 1) // m) * m


# ---------------------------------------------------------------------------
# Fused Upsample(x7, nearest) + AvgPool2d(k)
# ---------------------------------------------------------------------------
def _pool_matrix(in_size: int, scale: int, k: int) -> np.ndarray:
    """A[i, p] = (# of a in [0,k) with (i*k + a)//scale == p) / k."""
    out_size = (in_size * scale) // k
    a = np.zeros((out_size, in_size), dtype=np.float32)
    for i in range(out_size):
        for off in range(k):
            a[i, (i * k + off) // scale] += 1.0 / k
    return a


def _pool_kernel(ah_ref, awT_ref, x_ref, o_ref):
    # ah: (Ho, H) bf16, awT: (W, Wo) bf16, x: (B, H, W) f32, o: (B, Ho, Wo) bf16
    B, H, W = x_ref.shape
    Wo = awT_ref.shape[1]
    # W-pool for all B planes as ONE 2-D MXU matmul; cast to bf16 in-kernel
    # (pool-matrix entries are exact multiples of 1/k), f32 accumulation.
    x = x_ref[...].astype(jnp.bfloat16).reshape(B * H, W)
    t = jnp.dot(x, awT_ref[...], preferred_element_type=jnp.float32)
    t = t.astype(jnp.bfloat16).reshape(B, H, Wo)
    # H-pool per plane: short static unrolled loop (B == 1 at realistic H).
    for b in range(B):
        o_ref[b] = jnp.dot(ah_ref[...], t[b],
                           preferred_element_type=jnp.float32
                           ).astype(o_ref.dtype)


def upsample_avgpool(image: jnp.ndarray, *, scale: int, k: int) -> jnp.ndarray:
    """image: (N, C, H, W) f32 -> (N, C, H*scale//k, W*scale//k) bf16."""
    N, C, H, W = image.shape
    Ho = (H * scale) // k
    Wo = (W * scale) // k
    NC = N * C
    # Planes per grid step: B*H ~ MXU K for tiny H; B=1 for realistic StyleGAN
    # sizes (one f32 plane double-buffered fits every generation's default
    # scoped-VMEM limit, incl. v7x).
    B = min(NC, max(1, 256 // H))

    ah = jnp.asarray(_pool_matrix(H, scale, k), jnp.bfloat16)        # (Ho, H)
    awT = jnp.asarray(_pool_matrix(W, scale, k).T, jnp.bfloat16)     # (W, Wo)

    planes = image.reshape(NC, H, W)   # free reshape; no wrapper cast / pad
    out = pl.pallas_call(
        _pool_kernel,
        out_shape=jax.ShapeDtypeStruct((NC, Ho, Wo), jnp.bfloat16),
        grid=(pl.cdiv(NC, B),),        # partial last block handled by Pallas
        in_specs=[
            pl.BlockSpec((Ho, H), lambda i: (0, 0)),      # resident, tiny
            pl.BlockSpec((W, Wo), lambda i: (0, 0)),      # resident, tiny
            pl.BlockSpec((B, H, W), lambda i: (i, 0, 0)),
        ],
        out_specs=pl.BlockSpec((B, Ho, Wo), lambda i: (i, 0, 0)),
        compiler_params=pltpu.CompilerParams(
            dimension_semantics=("parallel",)),
    )(ah, awT, planes)
    return out.reshape(N, C, Ho, Wo)


# ---------------------------------------------------------------------------
# Synthetic CLIP-like model:
#   logits_per_image = 100 * norm(img @ W_i) @ norm(txt @ W_t)^T
# ---------------------------------------------------------------------------
def _img_embed_kernel(img_ref, wimg_ref, o_ref):
    kk = pl.program_id(1)

    @pl.when(kk == 0)
    def _():
        o_ref[...] = jnp.zeros_like(o_ref)

    # Accumulate directly into the resident f32 output block (no scratch).
    o_ref[...] += jnp.dot(img_ref[...], wimg_ref[...],
                          preferred_element_type=jnp.float32)


def _logits_kernel(iemb_ref, txt_ref, wtxt_ref, o_ref):
    # One-shot epilogue: text projection + both L2 norms + logit matmul.
    te = jnp.dot(txt_ref[...], wtxt_ref[...],
                 preferred_element_type=jnp.float32)             # (M_pad, E_pad)
    te = te * lax.rsqrt(jnp.sum(te * te, axis=-1, keepdims=True) + 1e-12)
    ie = iemb_ref[...]                                           # (N_pad, E_pad)
    ie = ie * lax.rsqrt(jnp.sum(ie * ie, axis=-1, keepdims=True) + 1e-12)
    o_ref[...] = 100.0 * lax.dot_general(
        ie, te, dimension_numbers=(((1,), (1,)), ((), ())),
        preferred_element_type=jnp.float32)


def prepare_clip_params(w_img, w_txt, *, tk: int = 4096):
    """Pad + cast the (synthetic) CLIP projection weights ONCE, at init time."""
    D, E = w_img.shape
    T, E2 = w_txt.shape
    assert E2 == E
    tk = min(tk, _round_up(D, 128))            # K tile (multiple of 128)
    D_pad = _round_up(D, tk)
    E_pad = _round_up(E, 128)
    if E_pad >= 256:                           # two E tiles -> megacore parallel
        E_pad = _round_up(E, 256)
        tE = E_pad // 2
    else:
        tE = E_pad
    T_pad = _round_up(T, 128)
    wimg_p = jnp.zeros((D_pad, E_pad), jnp.bfloat16
                       ).at[:D, :E].set(w_img.astype(jnp.bfloat16))
    wtxt_p = jnp.zeros((T_pad, E_pad), jnp.bfloat16
                       ).at[:T, :E].set(w_txt.astype(jnp.bfloat16))
    return dict(wimg_p=wimg_p, wtxt_p=wtxt_p, tk=tk, tE=tE, D=D, E=E, T=T)


def clip_model(img_flat, text, params):
    wimg_p, wtxt_p = params["wimg_p"], params["wtxt_p"]
    tk, tE = params["tk"], params["tE"]
    D, E, T = params["D"], params["E"], params["T"]
    D_pad, E_pad = wimg_p.shape
    T_pad = wtxt_p.shape[0]
    N = img_flat.shape[0]
    M = text.shape[0]
    assert img_flat.shape[1] == D and text.shape[1] == T
    N_pad = _round_up(N, 8)
    M_pad = _round_up(M, 128)
    n_k = D_pad // tk
    n_e = E_pad // tE

    img_p = jnp.zeros((N_pad, D_pad), jnp.bfloat16
                      ).at[:N, :D].set(img_flat.astype(jnp.bfloat16))
    txt_p = jnp.zeros((M_pad, T_pad), jnp.bfloat16
                      ).at[:M, :T].set(text.astype(jnp.bfloat16))

    # Image projection: big K tiles stream w_img; E axis is megacore-parallel.
    img_emb = pl.pallas_call(
        _img_embed_kernel,
        out_shape=jax.ShapeDtypeStruct((N_pad, E_pad), jnp.float32),
        grid=(n_e, n_k),
        in_specs=[
            pl.BlockSpec((N_pad, tk), lambda e, kk: (0, kk)),   # img K-tiles
            pl.BlockSpec((tk, tE), lambda e, kk: (kk, e)),      # w_img tiles
        ],
        out_specs=pl.BlockSpec((N_pad, tE), lambda e, kk: (0, e)),
        compiler_params=pltpu.CompilerParams(
            dimension_semantics=("parallel", "arbitrary")),
    )(img_p, wimg_p)

    # Tiny epilogue (runs once): text branch + normalize + logits.
    logits = pl.pallas_call(
        _logits_kernel,
        out_shape=jax.ShapeDtypeStruct((N_pad, M_pad), jnp.float32),
    )(img_emb, txt_p, wtxt_p)
    return logits[:N, :M]


# ---------------------------------------------------------------------------
# Acc.forward
# ---------------------------------------------------------------------------
def acc_forward(image, text, clip_params, *, stylegan_size: int):
    k = stylegan_size // 32                        # AvgPool2d kernel_size
    pooled = upsample_avgpool(image, scale=7, k=k)
    N = pooled.shape[0]
    img_flat = pooled.reshape(N, -1)               # free reshape (unpadded out)
    logits_per_image = clip_model(img_flat, text, clip_params)  # model(...)[0]
    return logits_per_image / 100.0


if __name__ == "__main__":
    key = jax.random.PRNGKey(0)
    k_img, k_txt, k_wi, k_wt = jax.random.split(key, 4)

    # Small shapes: batch=2, channels=4, spatial=16, text dim=32, embed dim=32.
    N, C, H, W = 2, 4, 16, 16
    stylegan_size = 64             # -> AvgPool2d kernel_size = 64 // 32 = 2
    T, E = 32, 32

    pool_k = stylegan_size // 32
    Ho = (H * 7) // pool_k
    Wo = (W * 7) // pool_k
    D_img = C * Ho * Wo            # flattened pooled-image feature dim

    image = jax.random.normal(k_img, (N, C, H, W), jnp.float32)
    text = jax.random.normal(k_txt, (N, T), jnp.float32)
    w_img = jax.random.normal(k_wi, (D_img, E), jnp.float32) * 0.02
    w_txt = jax.random.normal(k_wt, (T, E), jnp.float32) * 0.02

    # Weight pad/cast hoisted to init (once).  tk=1024 here only to exercise
    # the K-tiled accumulation path on this small D (default is 4096).
    clip_params = prepare_clip_params(w_img, w_txt, tk=1024)

    out = acc_forward(image, text, clip_params, stylegan_size=stylegan_size)
    jax.block_until_ready(out)

    # Pure-JAX f32 reference of the same forward semantics.
    up = jnp.repeat(jnp.repeat(image, 7, axis=2), 7, axis=3)
    Ho_r, Wo_r = up.shape[2] // pool_k, up.shape[3] // pool_k
    pooled_ref = up[:, :, :Ho_r * pool_k, :Wo_r * pool_k].reshape(
        N, C, Ho_r, pool_k, Wo_r, pool_k).mean(axis=(3, 5))
    ie = pooled_ref.reshape(N, -1) @ w_img
    ie = ie / jnp.sqrt(jnp.sum(ie * ie, axis=-1, keepdims=True) + 1e-12)
    te = text @ w_txt
    te = te / jnp.sqrt(jnp.sum(te * te, axis=-1, keepdims=True) + 1e-12)
    ref = ie @ te.T                # == model(image, text)[0] / 100

    assert out.shape == (N, N) and out.dtype == jnp.float32
    assert bool(jnp.all(jnp.isfinite(out)))
    err = float(jnp.max(jnp.abs(out - jnp.asarray(ref))))
    assert err < 5e-2, f"max abs err {err}"
    print("KERNEL_OK")
</pallas_src>

<mosaic_0001>
module attributes {stable_mosaic.version = 11 : i64} {
  func.func @_pool_kernel(%arg0: i32, %arg1: memref<56x16xbf16, #tpu.memory_space<vmem>>, %arg2: memref<16x56xbf16, #tpu.memory_space<vmem>>, %arg3: memref<8x16x16xf32, #tpu.memory_space<vmem>>, %arg4: memref<8x56x56xbf16, #tpu.memory_space<vmem>>) attributes {dimension_semantics = [#tpu.dimension_semantics<parallel>], iteration_bounds = array<i64: 1>, scalar_prefetch = 0 : i64, scratch_operands = 0 : i64, tpu.core_type = #tpu.core_type<tc>, window_params = [{pipeline_mode = #tpu.pipeline_mode<synchronous>, transform_indices = @transform_0, window_bounds = array<i64: 56, 16>}, {pipeline_mode = #tpu.pipeline_mode<synchronous>, transform_indices = @transform_1, window_bounds = array<i64: 16, 56>}, {transform_indices = @transform_2, window_bounds = array<i64: 8, 16, 16>}, {transform_indices = @transform_3, window_bounds = array<i64: 8, 56, 56>}]} {
    %c0 = arith.constant 0 : index
    %c0_0 = arith.constant 0 : index
    %c0_1 = arith.constant 0 : index
    %0 = vector.load %arg3[%c0, %c0_0, %c0_1] : memref<8x16x16xf32, #tpu.memory_space<vmem>>, vector<8x16x16xf32>
    %1 = arith.truncf %0 : vector<8x16x16xf32> to vector<8x16x16xbf16>
    %2 = vector.shape_cast %1 : vector<8x16x16xbf16> to vector<128x16xbf16>
    %c0_2 = arith.constant 0 : index
    %c0_3 = arith.constant 0 : index
    %3 = vector.load %arg2[%c0_2, %c0_3] : memref<16x56xbf16, #tpu.memory_space<vmem>>, vector<16x56xbf16>
    %cst = arith.constant dense<0.000000e+00> : vector<128x56xf32>
    %4 = tpu.matmul %2, %3, %cst {dimension_numbers = #tpu.dot_dimension_numbers<[1], [0], [0], [1], [0, 0, 1, 1], [], []>} : vector<128x16xbf16>, vector<16x56xbf16>, vector<128x56xf32> -> vector<128x56xf32>
    %5 = arith.truncf %4 : vector<128x56xf32> to vector<128x56xbf16>
    %6 = vector.shape_cast %5 : vector<128x56xbf16> to vector<8x16x56xbf16>
    %c0_4 = arith.constant 0 : index
    %c0_5 = arith.constant 0 : index
    %7 = vector.load %arg1[%c0_4, %c0_5] : memref<56x16xbf16, #tpu.memory_space<vmem>>, vector<56x16xbf16>
    %8 = vector.extract_strided_slice %6 {offsets = [0, 0, 0], sizes = [1, 16, 56], strides = [1, 1, 1]} : vector<8x16x56xbf16> to vector<1x16x56xbf16>
    %9 = vector.shape_cast %8 : vector<1x16x56xbf16> to vector<16x56xbf16>
    %cst_6 = arith.constant dense<0.000000e+00> : vector<56x56xf32>
    %10 = tpu.matmul %7, %9, %cst_6 {dimension_numbers = #tpu.dot_dimension_numbers<[1], [0], [0], [1], [0, 0, 1, 1], [], []>} : vector<56x16xbf16>, vector<16x56xbf16>, vector<56x56xf32> -> vector<56x56xf32>
    %11 = arith.truncf %10 : vector<56x56xf32> to vector<56x56xbf16>
    %c0_7 = arith.constant 0 : index
    %c0_8 = arith.constant 0 : index
    %c0_9 = arith.constant 0 : index
    %12 = vector.load %arg4[%c0_7, %c0_8, %c0_9] : memref<8x56x56xbf16, #tpu.memory_space<vmem>>, vector<1x56x56xbf16>
    %13 = vector.shape_cast %12 : vector<1x56x56xbf16> to vector<56x56xbf16>
    %14 = vector.shape_cast %11 : vector<56x56xbf16> to vector<1x56x56xbf16>
    tpu.vector_store %arg4[%c0_7, %c0_8, %c0_9], %14 {strides = array<i32>} : memref<8x56x56xbf16, #tpu.memory_space<vmem>>, vector<1x56x56xbf16>,
    %c0_10 = arith.constant 0 : index
    %c0_11 = arith.constant 0 : index
    %15 = vector.load %arg1[%c0_10, %c0_11] : memref<56x16xbf16, #tpu.memory_space<vmem>>, vector<56x16xbf16>
    %16 = vector.extract_strided_slice %6 {offsets = [1, 0, 0], sizes = [1, 16, 56], strides = [1, 1, 1]} : vector<8x16x56xbf16> to vector<1x16x56xbf16>
    %17 = vector.shape_cast %16 : vector<1x16x56xbf16> to vector<16x56xbf16>
    %cst_12 = arith.constant dense<0.000000e+00> : vector<56x56xf32>
    %18 = tpu.matmul %15, %17, %cst_12 {dimension_numbers = #tpu.dot_dimension_numbers<[1], [0], [0], [1], [0, 0, 1, 1], [], []>} : vector<56x16xbf16>, vector<16x56xbf16>, vector<56x56xf32> -> vector<56x56xf32>
    %19 = arith.truncf %18 : vector<56x56xf32> to vector<56x56xbf16>
    %c1 = arith.constant 1 : index
    %c0_13 = arith.constant 0 : index
    %c0_14 = arith.constant 0 : index
    %20 = vector.load %arg4[%c1, %c0_13, %c0_14] : memref<8x56x56xbf16, #tpu.memory_space<vmem>>, vector<1x56x56xbf16>
    %21 = vector.shape_cast %20 : vector<1x56x56xbf16> to vector<56x56xbf16>
    %22 = vector.shape_cast %19 : vector<56x56xbf16> to vector<1x56x56xbf16>
    tpu.vector_store %arg4[%c1, %c0_13, %c0_14], %22 {strides = array<i32>} : memref<8x56x56xbf16, #tpu.memory_space<vmem>>, vector<1x56x56xbf16>,
    %c0_15 = arith.constant 0 : index
    %c0_16 = arith.constant 0 : index
    %23 = vector.load %arg1[%c0_15, %c0_16] : memref<56x16xbf16, #tpu.memory_space<vmem>>, vector<56x16xbf16>
    %24 = vector.extract_strided_slice %6 {offsets = [2, 0, 0], sizes = [1, 16, 56], strides = [1, 1, 1]} : vector<8x16x56xbf16> to vector<1x16x56xbf16>
    %25 = vector.shape_cast %24 : vector<1x16x56xbf16> to vector<16x56xbf16>
    %cst_17 = arith.constant dense<0.000000e+00> : vector<56x56xf32>
    %26 = tpu.matmul %23, %25, %cst_17 {dimension_numbers = #tpu.dot_dimension_numbers<[1], [0], [0], [1], [0, 0, 1, 1], [], []>} : vector<56x16xbf16>, vector<16x56xbf16>, vector<56x56xf32> -> vector<56x56xf32>
    %27 = arith.truncf %26 : vector<56x56xf32> to vector<56x56xbf16>
    %c2 = arith.constant 2 : index
    %c0_18 = arith.constant 0 : index
    %c0_19 = arith.constant 0 : index
    %28 = vector.load %arg4[%c2, %c0_18, %c0_19] : memref<8x56x56xbf16, #tpu.memory_space<vmem>>, vector<1x56x56xbf16>
    %29 = vector.shape_cast %28 : vector<1x56x56xbf16> to vector<56x56xbf16>
    %30 = vector.shape_cast %27 : vector<56x56xbf16> to vector<1x56x56xbf16>
    tpu.vector_store %arg4[%c2, %c0_18, %c0_19], %30 {strides = array<i32>} : memref<8x56x56xbf16, #tpu.memory_space<vmem>>, vector<1x56x56xbf16>,
    %c0_20 = arith.constant 0 : index
    %c0_21 = arith.constant 0 : index
    %31 = vector.load %arg1[%c0_20, %c0_21] : memref<56x16xbf16, #tpu.memory_space<vmem>>, vector<56x16xbf16>
    %32 = vector.extract_strided_slice %6 {offsets = [3, 0, 0], sizes = [1, 16, 56], strides = [1, 1, 1]} : vector<8x16x56xbf16> to vector<1x16x56xbf16>
    %33 = vector.shape_cast %32 : vector<1x16x56xbf16> to vector<16x56xbf16>
    %cst_22 = arith.constant dense<0.000000e+00> : vector<56x56xf32>
    %34 = tpu.matmul %31, %33, %cst_22 {dimension_numbers = #tpu.dot_dimension_numbers<[1], [0], [0], [1], [0, 0, 1, 1], [], []>} : vector<56x16xbf16>, vector<16x56xbf16>, vector<56x56xf32> -> vector<56x56xf32>
    %35 = arith.truncf %34 : vector<56x56xf32> to vector<56x56xbf16>
    %c3 = arith.constant 3 : index
    %c0_23 = arith.constant 0 : index
    %c0_24 = arith.constant 0 : index
    %36 = vector.load %arg4[%c3, %c0_23, %c0_24] : memref<8x56x56xbf16, #tpu.memory_space<vmem>>, vector<1x56x56xbf16>
    %37 = vector.shape_cast %36 : vector<1x56x56xbf16> to vector<56x56xbf16>
    %38 = vector.shape_cast %35 : vector<56x56xbf16> to vector<1x56x56xbf16>
    tpu.vector_store %arg4[%c3, %c0_23, %c0_24], %38 {strides = array<i32>} : memref<8x56x56xbf16, #tpu.memory_space<vmem>>, vector<1x56x56xbf16>,
    %c0_25 = arith.constant 0 : index
    %c0_26 = arith.constant 0 : index
    %39 = vector.load %arg1[%c0_25, %c0_26] : memref<56x16xbf16, #tpu.memory_space<vmem>>, vector<56x16xbf16>
    %40 = vector.extract_strided_slice %6 {offsets = [4, 0, 0], sizes = [1, 16, 56], strides = [1, 1, 1]} : vector<8x16x56xbf16> to vector<1x16x56xbf16>
    %41 = vector.shape_cast %40 : vector<1x16x56xbf16> to vector<16x56xbf16>
    %cst_27 = arith.constant dense<0.000000e+00> : vector<56x56xf32>
    %42 = tpu.matmul %39, %41, %cst_27 {dimension_numbers = #tpu.dot_dimension_numbers<[1], [0], [0], [1], [0, 0, 1, 1], [], []>} : vector<56x16xbf16>, vector<16x56xbf16>, vector<56x56xf32> -> vector<56x56xf32>
    %43 = arith.truncf %42 : vector<56x56xf32> to vector<56x56xbf16>
    %c4 = arith.constant 4 : index
    %c0_28 = arith.constant 0 : index
    %c0_29 = arith.constant 0 : index
    %44 = vector.load %arg4[%c4, %c0_28, %c0_29] : memref<8x56x56xbf16, #tpu.memory_space<vmem>>, vector<1x56x56xbf16>
    %45 = vector.shape_cast %44 : vector<1x56x56xbf16> to vector<56x56xbf16>
    %46 = vector.shape_cast %43 : vector<56x56xbf16> to vector<1x56x56xbf16>
    tpu.vector_store %arg4[%c4, %c0_28, %c0_29], %46 {strides = array<i32>} : memref<8x56x56xbf16, #tpu.memory_space<vmem>>, vector<1x56x56xbf16>,
    %c0_30 = arith.constant 0 : index
    %c0_31 = arith.constant 0 : index
    %47 = vector.load %arg1[%c0_30, %c0_31] : memref<56x16xbf16, #tpu.memory_space<vmem>>, vector<56x16xbf16>
    %48 = vector.extract_strided_slice %6 {offsets = [5, 0, 0], sizes = [1, 16, 56], strides = [1, 1, 1]} : vector<8x16x56xbf16> to vector<1x16x56xbf16>
    %49 = vector.shape_cast %48 : vector<1x16x56xbf16> to vector<16x56xbf16>
    %cst_32 = arith.constant dense<0.000000e+00> : vector<56x56xf32>
    %50 = tpu.matmul %47, %49, %cst_32 {dimension_numbers = #tpu.dot_dimension_numbers<[1], [0], [0], [1], [0, 0, 1, 1], [], []>} : vector<56x16xbf16>, vector<16x56xbf16>, vector<56x56xf32> -> vector<56x56xf32>
    %51 = arith.truncf %50 : vector<56x56xf32> to vector<56x56xbf16>
    %c5 = arith.constant 5 : index
    %c0_33 = arith.constant 0 : index
    %c0_34 = arith.constant 0 : index
    %52 = vector.load %arg4[%c5, %c0_33, %c0_34] : memref<8x56x56xbf16, #tpu.memory_space<vmem>>, vector<1x56x56xbf16>
    %53 = vector.shape_cast %52 : vector<1x56x56xbf16> to vector<56x56xbf16>
    %54 = vector.shape_cast %51 : vector<56x56xbf16> to vector<1x56x56xbf16>
    tpu.vector_store %arg4[%c5, %c0_33, %c0_34], %54 {strides = array<i32>} : memref<8x56x56xbf16, #tpu.memory_space<vmem>>, vector<1x56x56xbf16>,
    %c0_35 = arith.constant 0 : index
    %c0_36 = arith.constant 0 : index
    %55 = vector.load %arg1[%c0_35, %c0_36] : memref<56x16xbf16, #tpu.memory_space<vmem>>, vector<56x16xbf16>
    %56 = vector.extract_strided_slice %6 {offsets = [6, 0, 0], sizes = [1, 16, 56], strides = [1, 1, 1]} : vector<8x16x56xbf16> to vector<1x16x56xbf16>
    %57 = vector.shape_cast %56 : vector<1x16x56xbf16> to vector<16x56xbf16>
    %cst_37 = arith.constant dense<0.000000e+00> : vector<56x56xf32>
    %58 = tpu.matmul %55, %57, %cst_37 {dimension_numbers = #tpu.dot_dimension_numbers<[1], [0], [0], [1], [0, 0, 1, 1], [], []>} : vector<56x16xbf16>, vector<16x56xbf16>, vector<56x56xf32> -> vector<56x56xf32>
    %59 = arith.truncf %58 : vector<56x56xf32> to vector<56x56xbf16>
    %c6 = arith.constant 6 : index
    %c0_38 = arith.constant 0 : index
    %c0_39 = arith.constant 0 : index
    %60 = vector.load %arg4[%c6, %c0_38, %c0_39] : memref<8x56x56xbf16, #tpu.memory_space<vmem>>, vector<1x56x56xbf16>
    %61 = vector.shape_cast %60 : vector<1x56x56xbf16> to vector<56x56xbf16>
    %62 = vector.shape_cast %59 : vector<56x56xbf16> to vector<1x56x56xbf16>
    tpu.vector_store %arg4[%c6, %c0_38, %c0_39], %62 {strides = array<i32>} : memref<8x56x56xbf16, #tpu.memory_space<vmem>>, vector<1x56x56xbf16>,
    %c0_40 = arith.constant 0 : index
    %c0_41 = arith.constant 0 : index
    %63 = vector.load %arg1[%c0_40, %c0_41] : memref<56x16xbf16, #tpu.memory_space<vmem>>, vector<56x16xbf16>
    %64 = vector.extract_strided_slice %6 {offsets = [7, 0, 0], sizes = [1, 16, 56], strides = [1, 1, 1]} : vector<8x16x56xbf16> to vector<1x16x56xbf16>
    %65 = vector.shape_cast %64 : vector<1x16x56xbf16> to vector<16x56xbf16>
    %cst_42 = arith.constant dense<0.000000e+00> : vector<56x56xf32>
    %66 = tpu.matmul %63, %65, %cst_42 {dimension_numbers = #tpu.dot_dimension_numbers<[1], [0], [0], [1], [0, 0, 1, 1], [], []>} : vector<56x16xbf16>, vector<16x56xbf16>, vector<56x56xf32> -> vector<56x56xf32>
    %67 = arith.truncf %66 : vector<56x56xf32> to vector<56x56xbf16>
    %c7 = arith.constant 7 : index
    %c0_43 = arith.constant 0 : index
    %c0_44 = arith.constant 0 : index
    %68 = vector.load %arg4[%c7, %c0_43, %c0_44] : memref<8x56x56xbf16, #tpu.memory_space<vmem>>, vector<1x56x56xbf16>
    %69 = vector.shape_cast %68 : vector<1x56x56xbf16> to vector<56x56xbf16>
    %70 = vector.shape_cast %67 : vector<56x56xbf16> to vector<1x56x56xbf16>
    tpu.vector_store %arg4[%c7, %c0_43, %c0_44], %70 {strides = array<i32>} : memref<8x56x56xbf16, #tpu.memory_space<vmem>>, vector<1x56x56xbf16>,
    return
  }
  func.func @transform_0(%arg0: i32) -> (i32, i32) {
    %c0_i32 = arith.constant 0 : i32
    %c0_i32_0 = arith.constant 0 : i32
    %c0_i32_1 = arith.constant 0 : i32
    return %c0_i32, %c0_i32_0 : i32, i32
  }
  func.func @transform_1(%arg0: i32) -> (i32, i32) {
    %c0_i32 = arith.constant 0 : i32
    %c0_i32_0 = arith.constant 0 : i32
    %c0_i32_1 = arith.constant 0 : i32
    return %c0_i32, %c0_i32_0 : i32, i32
  }
  func.func @transform_2(%arg0: i32) -> (i32, i32, i32) {
    %c0_i32 = arith.constant 0 : i32
    %c0_i32_0 = arith.constant 0 : i32
    %c0_i32_1 = arith.constant 0 : i32
    return %arg0, %c0_i32, %c0_i32_0 : i32, i32, i32
  }
  func.func @transform_3(%arg0: i32) -> (i32, i32, i32) {
    %c0_i32 = arith.constant 0 : i32
    %c0_i32_0 = arith.constant 0 : i32
    %c0_i32_1 = arith.constant 0 : i32
    return %arg0, %c0_i32, %c0_i32_0 : i32, i32, i32
  }
}

</mosaic_0001>

<bundles_post_ra>
// kernel: tpu_custom_call.1
= control target key start
LH: loop header
LB: loop body
LE: loop exit
PB: predicated region body
PF: predicated region fallthrough
CT: control target
= control target key end

     0   :  { %8 = vsyncpa [#allocation3], 0  ;;  %s1977_s0 = inlined_call_operand.vmem [shape: bf16[56,16], index: 0, kind: input, shape index: {}]   ;;  %s1978_s1 = inlined_call_operand.vmem [shape: bf16[16,56], index: 1, kind: input, shape index: {}]   ;;  %s1979_s2 = inlined_call_operand.hbm [shape: f32[8,16,16], index: 2, kind: input, shape index: {}]   ;;  %s1980_s3 = inlined_call_operand.hbm [shape: bf16[8,56,56], index: 3, kind: output, shape index: {}]  }
   0x1   :  { %9 = vsyncpa [#allocation4], 0  ;;  %s1732_s12 = smov [#allocation2]   ;;  %s1684_s16 = scalar_lea.hbm %s1979_s2, 2048 }
   0x2   :  { %s19_s13 = sshll.u32 %s1732_s12, 4  ;;  %p1685_p0 = scmp.ne.s32.totalorder %s1979_s2, %s1684_s16  ;;  %s20_s13 = int_to_ptr.vmem [resolvable:$true] %s19_s13 }
   0x3   :  { %p1688_p1 = scmp.lt.u32.totalorder %s1684_s16, %s1979_s2 }
   0x5   :  { %p1690_p2 = pnand %p1688_p1, %p1685_p0 }
   0x7   :  { %1693 = shalt.err (!%p1690_p2)
}
   0x8   :  { %s1694_s21 = scalar_lea.vmem %s20_s13, 2048  ;;  %p1699_p4 = scmp.lt.s32.totalorder %s20_s13, %s20_s13 }
   0x9   :  { %p1695_p3 = scmp.ne.s32.totalorder %s20_s13, %s1694_s21  ;;  %p1700_p5 = scmp.lt.s32.totalorder %s1694_s21, %s1694_s21 }
   0xb   :  { %p1701_p6 = por %p1700_p5, %p1699_p4 }
   0xd   :  { %p1702_p7 = pnand %p1701_p6, %p1695_p3 }
   0xf   :  { %1705 = shalt.err (!%p1702_p7)
}
  0x10   :  { %s1733_s22 = smov 128   ;;  %s1734_s23 = smov 8  }
  0x11   :  { %25 = dma.hbm_to_vmem [thread:$0]  %s1979_s2, 2048, %s20_s13, [#allocation3], %s1733_s22, %s1733_s22, %s1734_s23  }
  0x12   :  { %1728 = dma.done.wait [#allocation3], 2048  }
  0x13   :  { %1729 = vsyncadd [#allocation3], 4294965248  ;;  %v1651_v0 = vld [vmem:[%s1978_s1] sm:$0xff]   ;;  %v30_v1 = vld [vmem:[#allocation2] sm:$0xff]  ;;  %vm62_vm0 = vcmask 130048   ;;  %vm322_vm1 = vcmask 453632  }
  0x14   :  { %v31_v2 = vld [vmem:[#allocation2 + $0x8] sm:$0xff]  ;;  %v32_v3 = vld [vmem:[#allocation2 + $0x10] sm:$0xff]  ;;  %1547 = vmatprep.subr.bf16.mxu0 %v1651_v0  ;;  %v33_v5 = vld [vmem:[#allocation2 + $0x18] sm:$0xff] }
  0x15   :  { %v46_v4 = vpack.c.bf16 %v31_v2, %v30_v1  ;;  %v34_v6 = vld [vmem:[#allocation2 + $0x20] sm:$0xff]  ;;  %v35_v7 = vld [vmem:[#allocation2 + $0x28] sm:$0xff]  ;;  %1548 = vmatpush3.bf16.msra.mxu0 %v1651_v0  ;;  %v47_v8 = vpack.c.bf16 %v33_v5, %v32_v3  ;;  %v36_v10 = vld [vmem:[#allocation2 + $0x30] sm:$0xff] }
  0x16   :  { %v48_v9 = vpack.c.bf16 %v35_v7, %v34_v6  ;;  %v37_v11 = vld [vmem:[#allocation2 + $0x38] sm:$0xff]  ;;  %v38_v12 = vld [vmem:[#allocation2 + $0x40] sm:$0xff]  ;;  %v39_v13 = vld [vmem:[#allocation2 + $0x48] sm:$0xff] }
  0x17   :  { %1549 = vmatprep.mubr.msk.bf16.mxu0 %vm62_vm0, %v46_v4  ;;  %v49_v14 = vpack.c.bf16 %v37_v11, %v36_v10  ;;  %v50_v15 = vpack.c.bf16 %v39_v13, %v38_v12  ;;  %v40_v16 = vld [vmem:[#allocation2 + $0x50] sm:$0xff]  ;;  %v41_v17 = vld [vmem:[#allocation2 + $0x58] sm:$0xff]  ;;  %v42_v18 = vld [vmem:[#allocation2 + $0x60] sm:$0xff] }
  0x18   :  { %1550 = vmatmul.mubr.msk.bf16.vlgmr.msra.gmra.mrb[0].mxu0 %vm62_vm0, %v47_v8  ;;  %v43_v19 = vld [vmem:[#allocation2 + $0x68] sm:$0xff]  ;;  %v51_v20 = vpack.c.bf16 %v41_v17, %v40_v16  ;;  %v44_v22 = vld [vmem:[#allocation2 + $0x70] sm:$0xff]  ;;  %v45_v23 = vld [vmem:[#allocation2 + $0x78] sm:$0xff] }
  0x19   :  { %1553 = vmatprep.mubr.msk.bf16.mxu0 %vm62_vm0, %v48_v9  ;;  %v52_v21 = vpack.c.bf16 %v43_v19, %v42_v18  ;;  %v53_v24 = vpack.c.bf16 %v45_v23, %v44_v22  ;;  %v1652_v25 = vld [vmem:[%s1977_s0] sm:$0xff]   ;;  %v1653_v33 = vld [vmem:[%s1977_s0 + $0x8] sm:$0xff]   ;;  %v1654_v34 = vld [vmem:[%s1977_s0 + $0x10] sm:$0xff]  }
  0x1a   :  { %1567 = vmatprep.mubr.msk.bf16.mxu1 %vm62_vm0, %v1652_v25  ;;  %v1660_v26 = vld [vmem:[%s1977_s0] sm:$0xff]   ;;  %v1655_v41 = vld [vmem:[%s1977_s0 + $0x18] ss:$0 sps:$4 sm:$0xff]   ;;  %v1662_v42 = vld [vmem:[%s1977_s0 + $0x8] sm:$0xff]  }
  0x1b   :  { %v1656_v43 = vld [vmem:[%s1977_s0] sm:$0xff]   ;;  %v1664_v44 = vld [vmem:[%s1977_s0 + $0x10] sm:$0xff]   ;;  %v1657_v51 = vld [vmem:[%s1977_s0 + $0x8] sm:$0xff]  }
  0x1c   :  { %v1666_v52 = vld [vmem:[%s1977_s0 + $0x18] ss:$0 sps:$4 sm:$0xff]   ;;  %v1658_v53 = vld [vmem:[%s1977_s0 + $0x10] sm:$0xff]   ;;  %v1668_v55 = vld [vmem:[%s1977_s0] sm:$0xff]  }
  0x1d   :  { %v1659_v61 = vld [vmem:[%s1977_s0 + $0x18] ss:$0 sps:$4 sm:$0xff]   ;;  %v1670_v62 = vld [vmem:[%s1977_s0 + $0x8] sm:$0xff]   ;;  %v1661_v63 = vld [vmem:[%s1977_s0] sm:$0xff]  }
  0x1e   :  { %v1672_v0 = vld [vmem:[%s1977_s0 + $0x10] sm:$0xff]   ;;  %v1663_v1 = vld [vmem:[%s1977_s0 + $0x8] sm:$0xff]   ;;  %v1674_v2 = vld [vmem:[%s1977_s0 + $0x18] ss:$0 sps:$4 sm:$0xff]  }
  0x1f   :  { %v1665_v3 = vld [vmem:[%s1977_s0 + $0x10] sm:$0xff]   ;;  %v1676_v4 = vld [vmem:[%s1977_s0] sm:$0xff]   ;;  %v1667_v5 = vld [vmem:[%s1977_s0 + $0x18] ss:$0 sps:$4 sm:$0xff]  }
  0x20   :  { %1554 = vmatmul.mubr.msk.bf16.gmra.mrb[4].mxu0 %vm62_vm0, %v49_v14  ;;  %v1678_v6 = vld [vmem:[%s1977_s0 + $0x8] sm:$0xff]   ;;  %v1669_v7 = vld [vmem:[%s1977_s0] sm:$0xff]   ;;  %v1680_v8 = vld [vmem:[%s1977_s0 + $0x10] sm:$0xff]  }
  0x21   :  { %1557 = vmatprep.mubr.msk.bf16.mxu0 %vm62_vm0, %v50_v15  ;;  %v1671_v9 = vld [vmem:[%s1977_s0 + $0x8] sm:$0xff]   ;;  %v1682_v10 = vld [vmem:[%s1977_s0 + $0x18] ss:$0 sps:$4 sm:$0xff]   ;;  %v1673_v11 = vld [vmem:[%s1977_s0 + $0x10] sm:$0xff]  }
  0x22   :  { %v1675_v12 = vld [vmem:[%s1977_s0 + $0x18] ss:$0 sps:$4 sm:$0xff]   ;;  %v1677_v13 = vld [vmem:[%s1977_s0] sm:$0xff]   ;;  %v1679_v14 = vld [vmem:[%s1977_s0 + $0x8] sm:$0xff]  }
  0x23   :  { %v1681_v15 = vld [vmem:[%s1977_s0 + $0x10] sm:$0xff]   ;;  %v1683_v16 = vld [vmem:[%s1977_s0 + $0x18] ss:$0 sps:$4 sm:$0xff]   ;;  %s1735_s0 = smov [#allocation5]  }
  0x24   :  { %s1301_s5 = sshll.u32 %s1735_s0, 4  ;;  %s1302_s5 = int_to_ptr.vmem [resolvable:$true] %s1301_s5 }
  0x25   :  { %s1706_s6 = scalar_lea.vmem %s1302_s5, 3584  ;;  %p1711_p9 = scmp.lt.s32.totalorder %s1302_s5, %s1302_s5 }
  0x26   :  { %p1707_p8 = scmp.ne.s32.totalorder %s1302_s5, %s1706_s6  ;;  %p1712_p10 = scmp.lt.s32.totalorder %s1706_s6, %s1706_s6 }
  0x28   :  { %1558 = vmatmul.mubr.msk.bf16.gmra.mrb[8].mxu0 %vm62_vm0, %v51_v20  ;;  %p1713_p11 = por %p1712_p10, %p1711_p9 }
  0x29   :  { %1561 = vmatprep.mubr.msk.bf16.mxu0 %vm62_vm0, %v52_v21 }
  0x2a   :  { %p1714_p12 = pnand %p1713_p11, %p1707_p8 }
  0x30   :  { %1562 = vmatmul.mubr.msk.bf16.gmra.mrb[12].mxu0 %vm62_vm0, %v53_v24 }
  0x31   :  { %1587 = vmatprep.mubr.msk.bf16.mxu0 %vm62_vm0, %v1660_v26 }
  0xeb   :  { %v1551_v27 = vpop.f32.mrb[0].mxu0 }
  0xec   :  { %v121_v28 = vpop.f32.mrb[1].mxu0 }
  0xed   :  { %v1552_v29 = vpop.f32.mrb[2].mxu0 }
  0xee   :  { %v185_v30 = vpack.c.bf16 %v1552_v29, %v1551_v27  ;;  %v124_v31 = vpop.f32.mrb[3].mxu0 }
  0xef   :  { %v184_v32 = vpack.c.bf16 %v124_v31, %v121_v28 }
  0xf1   :  { %1565 = vmatprep.subr.bf16.mxu1 %v184_v32 }
  0xf2   :  { %1566 = vmatpush3.bf16.msra.mxu1 %v184_v32 }
  0xf3   :  { %v1555_v35 = vpop.f32.mrb[4].mxu0  ;;  %1575 = vmatprep.subr.bf16.mxu1 %v185_v30 }
  0xf4   :  { %v137_v36 = vpop.f32.mrb[5].mxu0 }
  0xf5   :  { %v1556_v37 = vpop.f32.mrb[6].mxu0  ;;  %1568 = vmatmul.mubr.msk.bf16.vlgmr.msra.gmra.mrb[0].mxu1 %vm62_vm0, %v1653_v33 }
  0xf6   :  { %v187_v38 = vpack.c.bf16 %v1556_v37, %v1555_v35  ;;  %v140_v39 = vpop.f32.mrb[7].mxu0  ;;  %1576 = vmatpush3.bf16.msra.mxu1 %v185_v30  ;;  %1571 = vmatprep.mubr.msk.bf16.mxu1 %vm62_vm0, %v1654_v34 }
  0xf7   :  { %v186_v40 = vpack.c.bf16 %v140_v39, %v137_v36 }
  0xf8   :  { %1595 = vmatprep.subr.bf16.mxu1 %v187_v38 }
  0xf9   :  { %1585 = vmatprep.subr.bf16.mxu0 %v186_v40 }
  0xfa   :  { %1586 = vmatpush3.bf16.msra.mxu0 %v186_v40 }
  0xfb   :  { %v1559_v45 = vpop.f32.mrb[8].mxu0 }
  0xfc   :  { %v153_v46 = vpop.f32.mrb[9].mxu0 }
  0xfd   :  { %1572 = vmatmul.mubr.msk.bf16.gmra.mrb[4].mxu1 %vm62_vm0, %v1655_v41  ;;  %v1560_v47 = vpop.f32.mrb[10].mxu0  ;;  %1588 = vmatmul.mubr.msk.bf16.vlgmr.msra.gmra.mrb[16].mxu0 %vm62_vm0, %v1662_v42 }
  0xfe   :  { %1577 = vmatprep.mubr.msk.bf16.mxu1 %vm62_vm0, %v1656_v43  ;;  %v189_v48 = vpack.c.bf16 %v1560_v47, %v1559_v45  ;;  %v156_v49 = vpop.f32.mrb[11].mxu0  ;;  %1591 = vmatprep.mubr.msk.bf16.mxu0 %vm62_vm0, %v1664_v44 }
  0xff   :  { %v188_v50 = vpack.c.bf16 %v156_v49, %v153_v46 }
 0x101   :  { %1605 = vmatprep.subr.bf16.mxu0 %v188_v50 }
 0x102   :  { %1606 = vmatpush3.bf16.msra.mxu0 %v188_v50 }
 0x103   :  { %v1563_v54 = vpop.f32.mrb[12].mxu0 }
 0x104   :  { %v169_v56 = vpop.f32.mrb[13].mxu0 }
 0x105   :  { %1578 = vmatmul.mubr.msk.bf16.vlgmr.msra.gmra.mrb[8].mxu1 %vm62_vm0, %v1657_v51  ;;  %1592 = vmatmul.mubr.msk.bf16.gmra.mrb[20].mxu0 %vm62_vm0, %v1666_v52  ;;  %v1564_v57 = vpop.f32.mrb[14].mxu0 }
 0x106   :  { %1596 = vmatpush3.bf16.msra.mxu1 %v187_v38  ;;  %1581 = vmatprep.mubr.msk.bf16.mxu1 %vm62_vm0, %v1658_v53  ;;  %v191_v58 = vpack.c.bf16 %v1564_v57, %v1563_v54  ;;  %v172_v59 = vpop.f32.mrb[15].mxu0 }
 0x107   :  { %1615 = vmatprep.subr.bf16.mxu1 %v189_v48  ;;  %v190_v60 = vpack.c.bf16 %v172_v59, %v169_v56  ;;  %1607 = vmatprep.mubr.msk.bf16.mxu0 %vm62_vm0, %v1668_v55 }
 0x109   :  { %1625 = vmatprep.subr.bf16.mxu0 %v190_v60 }
 0x10d   :  { %1582 = vmatmul.mubr.msk.bf16.gmra.mrb[12].mxu1 %vm62_vm0, %v1659_v61  ;;  %1608 = vmatmul.mubr.msk.bf16.vlgmr.msra.gmra.mrb[24].mxu0 %vm62_vm0, %v1670_v62 }
 0x10e   :  { %1597 = vmatprep.mubr.msk.bf16.mxu1 %vm62_vm0, %v1661_v63  ;;  %1626 = vmatpush3.bf16.msra.mxu0 %v190_v60 }
 0x10f   :  { %1611 = vmatprep.mubr.msk.bf16.mxu0 %vm62_vm0, %v1672_v0 }
 0x115   :  { %1598 = vmatmul.mubr.msk.bf16.vlgmr.msra.gmra.mrb[16].mxu1 %vm62_vm0, %v1663_v1  ;;  %1612 = vmatmul.mubr.msk.bf16.gmra.mrb[28].mxu0 %vm62_vm0, %v1674_v2 }
 0x116   :  { %1616 = vmatpush3.bf16.msra.mxu1 %v189_v48  ;;  %1601 = vmatprep.mubr.msk.bf16.mxu1 %vm62_vm0, %v1665_v3 }
 0x117   :  { %1635 = vmatprep.subr.bf16.mxu1 %v191_v58  ;;  %1627 = vmatprep.mubr.msk.bf16.mxu0 %vm62_vm0, %v1676_v4 }
 0x11d   :  { %1602 = vmatmul.mubr.msk.bf16.gmra.mrb[20].mxu1 %vm62_vm0, %v1667_v5  ;;  %1628 = vmatmul.mubr.msk.bf16.vlgmr.msra.gmra.mrb[32].mxu0 %vm62_vm0, %v1678_v6 }
 0x11e   :  { %1617 = vmatprep.mubr.msk.bf16.mxu1 %vm62_vm0, %v1669_v7  ;;  %1631 = vmatprep.mubr.msk.bf16.mxu0 %vm62_vm0, %v1680_v8 }
 0x125   :  { %1618 = vmatmul.mubr.msk.bf16.vlgmr.msra.gmra.mrb[24].mxu1 %vm62_vm0, %v1671_v9  ;;  %1632 = vmatmul.mubr.msk.bf16.gmra.mrb[36].mxu0 %vm62_vm0, %v1682_v10 }
 0x126   :  { %1636 = vmatpush3.bf16.msra.mxu1 %v191_v58  ;;  %1621 = vmatprep.mubr.msk.bf16.mxu1 %vm62_vm0, %v1673_v11 }
 0x12d   :  { %1622 = vmatmul.mubr.msk.bf16.gmra.mrb[28].mxu1 %vm62_vm0, %v1675_v12 }
 0x12e   :  { %1637 = vmatprep.mubr.msk.bf16.mxu1 %vm62_vm0, %v1677_v13 }
 0x135   :  { %1638 = vmatmul.mubr.msk.bf16.vlgmr.msra.gmra.mrb[32].mxu1 %vm62_vm0, %v1679_v14 }
 0x136   :  { %1641 = vmatprep.mubr.msk.bf16.mxu1 %vm62_vm0, %v1681_v15 }
 0x13d   :  { %1642 = vmatmul.mubr.msk.bf16.gmra.mrb[36].mxu1 %vm62_vm0, %v1683_v16 }
 0x1c8   :  { %v1569_v17 = vpop.f32.mrb[0].mxu1 }
 0x1c9   :  { %v1444_v18 = vpack.c.bf16 %v1569_v17, %v1569_v17  ;;  %v263_v19 = vpop.f32.mrb[1].mxu1 }
 0x1ca   :  { %v1442_v20 = vpack.c.bf16 %v263_v19, %v263_v19  ;;  %v1570_v21 = vpop.f32.mrb[2].mxu1 }
 0x1cb   :  { %325 = vst.msk [vmem:[#allocation5 + $0x8] sm:$0xf] %vm322_vm1, %v1444_v18  ;;  %v1445_v22 = vpack.c.bf16 %v1570_v21, %v1570_v21  ;;  %v266_v23 = vpop.f32.mrb[3].mxu1 }
 0x1cc   :  { %323 = vst.msk [vmem:[#allocation5] sm:$0xf] %vm322_vm1, %v1442_v20  ;;  %v1443_v24 = vpack.c.bf16 %v266_v23, %v266_v23 }
 0x1cd   :  { %326 = vst.msk [vmem:[#allocation5 + $0xc] sm:$0xf] %vm322_vm1, %v1445_v22 }
 0x1ce   :  { %324 = vst.msk [vmem:[#allocation5 + $0x4] sm:$0xf] %vm322_vm1, %v1443_v24 }
 0x1d0   :  { %v1573_v25 = vpop.f32.mrb[4].mxu1  ;;  %v1589_v26 = vpop.f32.mrb[16].mxu0 }
 0x1d1   :  { %v1448_v27 = vpack.c.bf16 %v1573_v25, %v1573_v25  ;;  %v279_v28 = vpop.f32.mrb[5].mxu1  ;;  %v1458_v29 = vpack.c.bf16 %v1589_v26, %v1589_v26  ;;  %v539_v30 = vpop.f32.mrb[17].mxu0 }
 0x1d2   :  { %v1446_v31 = vpack.c.bf16 %v279_v28, %v279_v28  ;;  %v1574_v32 = vpop.f32.mrb[6].mxu1  ;;  %v1456_v33 = vpack.c.bf16 %v539_v30, %v539_v30  ;;  %v1590_v34 = vpop.f32.mrb[18].mxu0 }
 0x1d3   :  { %329 = vst.msk [vmem:[#allocation5 + $0x18] sm:$0xf] %vm322_vm1, %v1448_v27  ;;  %v282_v35 = vpop.f32.mrb[7].mxu1  ;;  %601 = vst.msk [vmem:[#allocation5 + $0x40] sm:$0xf] %vm322_vm1, %v1458_v29  ;;  %v1459_v36 = vpack.c.bf16 %v1590_v34, %v1590_v34  ;;  %v542_v37 = vpop.f32.mrb[19].mxu0 }
 0x1d4   :  { %327 = vst.msk [vmem:[#allocation5 + $0x10] sm:$0xf] %vm322_vm1, %v1446_v31  ;;  %v1447_v38 = vpack.c.bf16 %v282_v35, %v282_v35  ;;  %599 = vst.msk [vmem:[#allocation5 + $0x38] sm:$0xf] %vm322_vm1, %v1456_v33  ;;  %v1457_v39 = vpack.c.bf16 %v542_v37, %v542_v37 }
 0x1d5   :  { %602 = vst.msk [vmem:[#allocation5 + $0x44] sm:$0xf] %vm322_vm1, %v1459_v36 }
 0x1d6   :  { %328 = vst.msk [vmem:[#allocation5 + $0x14] sm:$0xf] %vm322_vm1, %v1447_v38  ;;  %600 = vst.msk [vmem:[#allocation5 + $0x3c] sm:$0xf] %vm322_vm1, %v1457_v39 }
 0x1d8   :  { %v1579_v40 = vpop.f32.mrb[8].mxu1  ;;  %v1593_v41 = vpop.f32.mrb[20].mxu0 }
 0x1d9   :  { %v1451_v42 = vpack.c.bf16 %v1579_v40, %v1579_v40  ;;  %v401_v43 = vpop.f32.mrb[9].mxu1  ;;  %v1462_v44 = vpack.c.bf16 %v1593_v41, %v1593_v41  ;;  %v555_v45 = vpop.f32.mrb[21].mxu0 }
 0x1da   :  { %v1449_v46 = vpack.c.bf16 %v401_v43, %v401_v43  ;;  %v1580_v47 = vpop.f32.mrb[10].mxu1  ;;  %v1460_v48 = vpack.c.bf16 %v555_v45, %v555_v45  ;;  %v1594_v49 = vpop.f32.mrb[22].mxu0 }
 0x1db   :  { %463 = vst.msk [vmem:[#allocation5 + $0x24] sm:$0xf] %vm322_vm1, %v1451_v42  ;;  %v1452_v50 = vpack.c.bf16 %v1580_v47, %v1580_v47  ;;  %v404_v51 = vpop.f32.mrb[11].mxu1  ;;  %605 = vst.msk [vmem:[#allocation5 + $0x50] sm:$0xf] %vm322_vm1, %v1462_v44  ;;  %v558_v52 = vpop.f32.mrb[23].mxu0 }
 0x1dc   :  { %461 = vst.msk [vmem:[#allocation5 + $0x1c] sm:$0xf] %vm322_vm1, %v1449_v46  ;;  %v1450_v53 = vpack.c.bf16 %v404_v51, %v404_v51  ;;  %603 = vst.msk [vmem:[#allocation5 + $0x48] sm:$0xf] %vm322_vm1, %v1460_v48  ;;  %v1461_v54 = vpack.c.bf16 %v558_v52, %v558_v52 }
 0x1dd   :  { %464 = vst.msk [vmem:[#allocation5 + $0x28] sm:$0xf] %vm322_vm1, %v1452_v50 }
 0x1de   :  { %462 = vst.msk [vmem:[#allocation5 + $0x20] sm:$0xf] %vm322_vm1, %v1450_v53  ;;  %604 = vst.msk [vmem:[#allocation5 + $0x4c] sm:$0xf] %vm322_vm1, %v1461_v54 }
 0x1e0   :  { %v1583_v55 = vpop.f32.mrb[12].mxu1  ;;  %v1609_v56 = vpop.f32.mrb[24].mxu0 }
 0x1e1   :  { %v1455_v57 = vpack.c.bf16 %v1583_v55, %v1583_v55  ;;  %v417_v58 = vpop.f32.mrb[13].mxu1  ;;  %v1472_v59 = vpack.c.bf16 %v1609_v56, %v1609_v56  ;;  %v815_v60 = vpop.f32.mrb[25].mxu0 }
 0x1e2   :  { %v1453_v61 = vpack.c.bf16 %v417_v58, %v417_v58  ;;  %v1584_v62 = vpop.f32.mrb[14].mxu1  ;;  %v1470_v63 = vpack.c.bf16 %v815_v60, %v815_v60  ;;  %v1610_v0 = vpop.f32.mrb[26].mxu0 }
 0x1e3   :  { %467 = vst.msk [vmem:[#allocation5 + $0x34] sm:$0xf] %vm322_vm1, %v1455_v57  ;;  %v420_v1 = vpop.f32.mrb[15].mxu1  ;;  %877 = vst.msk [vmem:[#allocation5 + $0x78] sm:$0xf] %vm322_vm1, %v1472_v59  ;;  %v1473_v2 = vpack.c.bf16 %v1610_v0, %v1610_v0  ;;  %v818_v3 = vpop.f32.mrb[27].mxu0 }
 0x1e4   :  { %465 = vst.msk [vmem:[#allocation5 + $0x2c] sm:$0xf] %vm322_vm1, %v1453_v61  ;;  %v1454_v4 = vpack.c.bf16 %v420_v1, %v420_v1  ;;  %875 = vst.msk [vmem:[#allocation5 + $0x70] sm:$0xf] %vm322_vm1, %v1470_v63  ;;  %v1471_v5 = vpack.c.bf16 %v818_v3, %v818_v3 }
 0x1e5   :  { %878 = vst.msk [vmem:[#allocation5 + $0x7c] sm:$0xf] %vm322_vm1, %v1473_v2 }
 0x1e6   :  { %466 = vst.msk [vmem:[#allocation5 + $0x30] sm:$0xf] %vm322_vm1, %v1454_v4  ;;  %876 = vst.msk [vmem:[#allocation5 + $0x74] sm:$0xf] %vm322_vm1, %v1471_v5 }
 0x1e8   :  { %v1599_v6 = vpop.f32.mrb[16].mxu1  ;;  %v1613_v7 = vpop.f32.mrb[28].mxu0 }
 0x1e9   :  { %v1465_v8 = vpack.c.bf16 %v1599_v6, %v1599_v6  ;;  %v677_v9 = vpop.f32.mrb[17].mxu1  ;;  %v1476_v10 = vpack.c.bf16 %v1613_v7, %v1613_v7  ;;  %v831_v11 = vpop.f32.mrb[29].mxu0 }
 0x1ea   :  { %v1463_v12 = vpack.c.bf16 %v677_v9, %v677_v9  ;;  %v1600_v13 = vpop.f32.mrb[18].mxu1  ;;  %v1474_v14 = vpack.c.bf16 %v831_v11, %v831_v11  ;;  %v1614_v15 = vpop.f32.mrb[30].mxu0 }
 0x1eb   :  { %739 = vst.msk [vmem:[#allocation5 + $0x5c] sm:$0xf] %vm322_vm1, %v1465_v8  ;;  %v1466_v16 = vpack.c.bf16 %v1600_v13, %v1600_v13  ;;  %v680_v17 = vpop.f32.mrb[19].mxu1  ;;  %881 = vst.msk [vmem:[#allocation5 + $0x88] sm:$0xf] %vm322_vm1, %v1476_v10  ;;  %v834_v18 = vpop.f32.mrb[31].mxu0 }
 0x1ec   :  { %737 = vst.msk [vmem:[#allocation5 + $0x54] sm:$0xf] %vm322_vm1, %v1463_v12  ;;  %v1464_v19 = vpack.c.bf16 %v680_v17, %v680_v17  ;;  %879 = vst.msk [vmem:[#allocation5 + $0x80] sm:$0xf] %vm322_vm1, %v1474_v14  ;;  %v1475_v20 = vpack.c.bf16 %v834_v18, %v834_v18 }
 0x1ed   :  { %740 = vst.msk [vmem:[#allocation5 + $0x60] sm:$0xf] %vm322_vm1, %v1466_v16 }
 0x1ee   :  { %738 = vst.msk [vmem:[#allocation5 + $0x58] sm:$0xf] %vm322_vm1, %v1464_v19  ;;  %880 = vst.msk [vmem:[#allocation5 + $0x84] sm:$0xf] %vm322_vm1, %v1475_v20 }
 0x1f0   :  { %v1603_v21 = vpop.f32.mrb[20].mxu1  ;;  %v1629_v22 = vpop.f32.mrb[32].mxu0 }
 0x1f1   :  { %v1469_v23 = vpack.c.bf16 %v1603_v21, %v1603_v21  ;;  %v693_v24 = vpop.f32.mrb[21].mxu1  ;;  %v1486_v25 = vpack.c.bf16 %v1629_v22, %v1629_v22  ;;  %v1091_v26 = vpop.f32.mrb[33].mxu0 }
 0x1f2   :  { %v1467_v27 = vpack.c.bf16 %v693_v24, %v693_v24  ;;  %v1604_v28 = vpop.f32.mrb[22].mxu1  ;;  %v1484_v29 = vpack.c.bf16 %v1091_v26, %v1091_v26  ;;  %v1630_v30 = vpop.f32.mrb[34].mxu0 }
 0x1f3   :  { %743 = vst.msk [vmem:[#allocation5 + $0x6c] sm:$0xf] %vm322_vm1, %v1469_v23  ;;  %v696_v31 = vpop.f32.mrb[23].mxu1  ;;  %1153 = vst.msk [vmem:[#allocation5 + $0xb0] sm:$0xf] %vm322_vm1, %v1486_v25  ;;  %v1487_v32 = vpack.c.bf16 %v1630_v30, %v1630_v30  ;;  %v1094_v33 = vpop.f32.mrb[35].mxu0 }
 0x1f4   :  { %741 = vst.msk [vmem:[#allocation5 + $0x64] sm:$0xf] %vm322_vm1, %v1467_v27  ;;  %v1468_v34 = vpack.c.bf16 %v696_v31, %v696_v31  ;;  %1151 = vst.msk [vmem:[#allocation5 + $0xa8] sm:$0xf] %vm322_vm1, %v1484_v29  ;;  %v1485_v35 = vpack.c.bf16 %v1094_v33, %v1094_v33 }
 0x1f5   :  { %1154 = vst.msk [vmem:[#allocation5 + $0xb4] sm:$0xf] %vm322_vm1, %v1487_v32 }
 0x1f6   :  { %742 = vst.msk [vmem:[#allocation5 + $0x68] sm:$0xf] %vm322_vm1, %v1468_v34  ;;  %1152 = vst.msk [vmem:[#allocation5 + $0xac] sm:$0xf] %vm322_vm1, %v1485_v35 }
 0x1f8   :  { %v1619_v36 = vpop.f32.mrb[24].mxu1  ;;  %v1633_v37 = vpop.f32.mrb[36].mxu0 }
 0x1f9   :  { %v1479_v38 = vpack.c.bf16 %v1619_v36, %v1619_v36  ;;  %v953_v39 = vpop.f32.mrb[25].mxu1  ;;  %v1490_v40 = vpack.c.bf16 %v1633_v37, %v1633_v37  ;;  %v1107_v41 = vpop.f32.mrb[37].mxu0 }
 0x1fa   :  { %v1477_v42 = vpack.c.bf16 %v953_v39, %v953_v39  ;;  %v1620_v43 = vpop.f32.mrb[26].mxu1  ;;  %v1488_v44 = vpack.c.bf16 %v1107_v41, %v1107_v41  ;;  %v1634_v45 = vpop.f32.mrb[38].mxu0 }
 0x1fb   :  { %1015 = vst.msk [vmem:[#allocation5 + $0x94] sm:$0xf] %vm322_vm1, %v1479_v38  ;;  %v1480_v46 = vpack.c.bf16 %v1620_v43, %v1620_v43  ;;  %v956_v47 = vpop.f32.mrb[27].mxu1  ;;  %1157 = vst.msk [vmem:[#allocation5 + $0xc0] sm:$0xf] %vm322_vm1, %v1490_v40  ;;  %v1110_v48 = vpop.f32.mrb[39].mxu0 }
 0x1fc   :  { %1013 = vst.msk [vmem:[#allocation5 + $0x8c] sm:$0xf] %vm322_vm1, %v1477_v42  ;;  %v1478_v49 = vpack.c.bf16 %v956_v47, %v956_v47  ;;  %1155 = vst.msk [vmem:[#allocation5 + $0xb8] sm:$0xf] %vm322_vm1, %v1488_v44  ;;  %v1489_v50 = vpack.c.bf16 %v1110_v48, %v1110_v48 }
 0x1fd   :  { %1016 = vst.msk [vmem:[#allocation5 + $0x98] sm:$0xf] %vm322_vm1, %v1480_v46 }
 0x1fe   :  { %1014 = vst.msk [vmem:[#allocation5 + $0x90] sm:$0xf] %vm322_vm1, %v1478_v49  ;;  %1156 = vst.msk [vmem:[#allocation5 + $0xbc] sm:$0xf] %vm322_vm1, %v1489_v50 }
 0x200   :  { %v1623_v51 = vpop.f32.mrb[28].mxu1 }
 0x201   :  { %v1483_v52 = vpack.c.bf16 %v1623_v51, %v1623_v51  ;;  %v969_v53 = vpop.f32.mrb[29].mxu1 }
 0x202   :  { %v1481_v54 = vpack.c.bf16 %v969_v53, %v969_v53  ;;  %v1624_v55 = vpop.f32.mrb[30].mxu1 }
 0x203   :  { %1019 = vst.msk [vmem:[#allocation5 + $0xa4] sm:$0xf] %vm322_vm1, %v1483_v52  ;;  %v972_v56 = vpop.f32.mrb[31].mxu1 }
 0x204   :  { %1017 = vst.msk [vmem:[#allocation5 + $0x9c] sm:$0xf] %vm322_vm1, %v1481_v54  ;;  %v1482_v57 = vpack.c.bf16 %v972_v56, %v972_v56 }
 0x206   :  { %1018 = vst.msk [vmem:[#allocation5 + $0xa0] sm:$0xf] %vm322_vm1, %v1482_v57 }
 0x208   :  { %v1639_v58 = vpop.f32.mrb[32].mxu1 }
 0x209   :  { %v1493_v59 = vpack.c.bf16 %v1639_v58, %v1639_v58  ;;  %v1229_v60 = vpop.f32.mrb[33].mxu1 }
 0x20a   :  { %v1491_v61 = vpack.c.bf16 %v1229_v60, %v1229_v60  ;;  %v1640_v62 = vpop.f32.mrb[34].mxu1 }
 0x20b   :  { %1291 = vst.msk [vmem:[#allocation5 + $0xcc] sm:$0xf] %vm322_vm1, %v1493_v59  ;;  %v1494_v63 = vpack.c.bf16 %v1640_v62, %v1640_v62  ;;  %v1232_v0 = vpop.f32.mrb[35].mxu1 }
 0x20c   :  { %1289 = vst.msk [vmem:[#allocation5 + $0xc4] sm:$0xf] %vm322_vm1, %v1491_v61  ;;  %v1492_v1 = vpack.c.bf16 %v1232_v0, %v1232_v0 }
 0x20d   :  { %1292 = vst.msk [vmem:[#allocation5 + $0xd0] sm:$0xf] %vm322_vm1, %v1494_v63 }
 0x20e   :  { %1290 = vst.msk [vmem:[#allocation5 + $0xc8] sm:$0xf] %vm322_vm1, %v1492_v1 }
 0x210   :  { %v1643_v2 = vpop.f32.mrb[36].mxu1 }
 0x211   :  { %v1497_v3 = vpack.c.bf16 %v1643_v2, %v1643_v2  ;;  %v1245_v4 = vpop.f32.mrb[37].mxu1 }
 0x212   :  { %v1495_v5 = vpack.c.bf16 %v1245_v4, %v1245_v4  ;;  %v1644_v6 = vpop.f32.mrb[38].mxu1 }
 0x213   :  { %1295 = vst.msk [vmem:[#allocation5 + $0xdc] sm:$0xf] %vm322_vm1, %v1497_v3  ;;  %v1248_v7 = vpop.f32.mrb[39].mxu1 }
 0x214   :  { %1293 = vst.msk [vmem:[#allocation5 + $0xd4] sm:$0xf] %vm322_vm1, %v1495_v5  ;;  %v1496_v8 = vpack.c.bf16 %v1248_v7, %v1248_v7 }
 0x216   :  { %1294 = vst.msk [vmem:[#allocation5 + $0xd8] sm:$0xf] %vm322_vm1, %v1496_v8 }
 0x217   :  { %1717 = shalt.err (!%p1714_p12)
}
 0x218   :  { %s1718_s9 = scalar_lea.hbm %s1980_s3, 3584 }
 0x219   :  { %p1719_p13 = scmp.ne.s32.totalorder %s1980_s3, %s1718_s9  ;;  %p1722_p0 = scmp.lt.u32.totalorder %s1718_s9, %s1980_s3 }
 0x21b   :  { %p1724_p1 = pnand %p1722_p0, %p1719_p13 }
 0x21d   :  { %1727 = shalt.err (!%p1724_p1)
}
 0x21e   :  { %s1736_s14 = smov 64   ;;  %s1737_s15 = smov 4  }
 0x21f   :  { %1307 = dma.vmem_to_hbm [thread:$0]  %s1302_s5, 3584, %s1980_s3, [#allocation4], %s1736_s14, %s1736_s14, %s1737_s15  }
 0x220   :  { %1730 = dma.done.wait [#allocation4], 3584  }
 0x221   :  { %1731 = vsyncadd [#allocation4], 4294963712 }
 0x222   :  { %1311 = vsyncpa [#allocation3], 1 }
 0x223   :  { %1312 = vsyncpa [#allocation4], 1 }

</bundles_post_ra>
